<compile_context>
chip_gen: v5e
topology: v5e:2x2
jax: 0.10.0
libtpu: 0.0.40
codegen_flags: <defaults>
</compile_context>

<pallas_src>
import jax
import jax.numpy as jnp
from jax.experimental import pallas as pl
from jax.experimental.pallas import tpu as pltpu


def make_conv_hardsig_kernel(n_batch, hw):
    def kernel(w_ref, x_ref, o_ref):
        # w_ref: (Cout, Kp)      flattened weights, bias folded into column K
        # x_ref: (Kp, N*HW)      im2col patches for the whole batch (ones-row at K)
        # o_ref: (N, Cout, HW)   NCHW output with flattened spatial lane axis
        acc = jnp.dot(
            w_ref[...],
            x_ref[...],
            preferred_element_type=jnp.float32,
            precision=jax.lax.Precision.HIGHEST,
        )                                        # (Cout, N*HW), one MXU push
        # v2 = v1 + 3 ; clamp_min(0) ; clamp_max(6) ; / 6
        y = jnp.clip(acc + 3.0, 0.0, 6.0) * (1.0 / 6.0)
        for n in range(n_batch):                 # static unroll (N=2)
            # static, 128-aligned lane slice -> dense (Cout, HW) store
            o_ref[n] = y[:, n * hw:(n + 1) * hw].astype(o_ref.dtype)

    return kernel


def conv_hardsigmoid(x_nchw, w_oihw, b):
    """x_nchw: (N, Cin, H, W) f32; w_oihw: (Cout, Cin, KH, KW); b: (Cout,)."""
    N, Cin, H, W = x_nchw.shape
    Cout, _, KH, KW = w_oihw.shape
    ph, pw = KH // 2, KW // 2
    HW = H * W
    NHW = N * HW
    K = Cin * KH * KW            # 27
    Kp = 32                      # pad contraction dim to a multiple of 8 sublanes

    # --- wrapper-side layout plumbing (cheap at these sizes) ---
    # zero padding in NCHW
    x_pad = jnp.pad(x_nchw, ((0, 0), (0, 0), (ph, ph), (pw, pw)))   # (N, Cin, H+2, W+2)
    # im2col with contraction ordering (cin, kh, kw); lane ordering (n, h, w)
    cols = jnp.stack(
        [x_pad[:, :, kh:kh + H, kw:kw + W] for kh in range(KH) for kw in range(KW)],
        axis=2,
    )                                                               # (N, Cin, KH*KW, H, W)
    patches = jnp.transpose(cols, (1, 2, 0, 3, 4)).reshape(K, NHW)  # (27, N*HW)
    # pad K -> Kp: row K is all-ones (bias fold), remaining rows are zero
    patches_p = jnp.concatenate(
        [patches,
         jnp.ones((1, NHW), x_nchw.dtype),
         jnp.zeros((Kp - K - 1, NHW), x_nchw.dtype)],
        axis=0,
    )                                                               # (32, N*HW)
    # weight flattened to (Cout, K) with matching (cin, kh, kw) ordering,
    # bias folded into column K, zero padding to Kp
    w_p = jnp.concatenate(
        [w_oihw.reshape(Cout, K),
         b.reshape(Cout, 1),
         jnp.zeros((Cout, Kp - K - 1), w_oihw.dtype)],
        axis=1,
    )                                                               # (16, 32)

    kernel = make_conv_hardsig_kernel(N, HW)

    out_flat = pl.pallas_call(
        kernel,
        out_shape=jax.ShapeDtypeStruct((N, Cout, HW), x_nchw.dtype),
        grid_spec=pltpu.PrefetchScalarGridSpec(
            num_scalar_prefetch=0,
            grid=(1,),                                   # single step: no pipeline handoff
            in_specs=[
                pl.BlockSpec((Cout, Kp), lambda i: (0, 0)),
                pl.BlockSpec((Kp, NHW), lambda i: (0, 0)),
            ],
            out_specs=pl.BlockSpec((N, Cout, HW), lambda i: (0, 0, 0)),
        ),
        compiler_params=pltpu.CompilerParams(
            dimension_semantics=("arbitrary",),
        ),
    )(w_p, patches_p)

    # free reshape back to NCHW spatial layout
    return out_flat.reshape(N, Cout, H, W)
    # TODO(synk): if H*W / channel counts scale up, move im2col into the kernel
    # (resident padded tile + pl.ds / pltpu.roll shifted operands) to cut the 9x
    # HBM patches traffic; unnecessary at 16x16.


def reference(x_nchw, w_oihw, b):
    y = jax.lax.conv_general_dilated(
        x_nchw, w_oihw, window_strides=(1, 1), padding="SAME",
        dimension_numbers=("NCHW", "OIHW", "NCHW"),
        precision=jax.lax.Precision.HIGHEST,
    ) + b.reshape(1, -1, 1, 1)
    return jnp.clip(y + 3.0, 0.0, 6.0) / 6.0


if __name__ == "__main__":
    key = jax.random.PRNGKey(0)
    kx, kw, kb = jax.random.split(key, 3)

    # Small shapes consistent with the module: N=2, Cin=3, H=W=16, Cout=16, k=3.
    N, Cin, H, W, Cout, Ksz = 2, 3, 16, 16, 16, 3
    x = jax.random.normal(kx, (N, Cin, H, W), dtype=jnp.float32)
    # Deterministic parameter init (kaiming-uniform-ish scale, synthetic).
    fan_in = Cin * Ksz * Ksz
    bound = 1.0 / (fan_in ** 0.5)
    weight = jax.random.uniform(kw, (Cout, Cin, Ksz, Ksz), jnp.float32, -bound, bound)
    bias = jax.random.uniform(kb, (Cout,), jnp.float32, -bound, bound)

    out = conv_hardsigmoid(x, weight, bias)
    out = jax.block_until_ready(out)

    ref = reference(x, weight, bias)
    assert out.shape == (N, Cout, H, W)
    assert jnp.allclose(out, ref, atol=1e-5, rtol=1e-5)

    print("KERNEL_OK")
</pallas_src>

<mosaic_0001>
module attributes {stable_mosaic.version = 11 : i64} {
  func.func @kernel(%arg0: i32, %arg1: memref<16x32xf32, #tpu.memory_space<vmem>>, %arg2: memref<32x512xf32, #tpu.memory_space<vmem>>, %arg3: memref<2x16x256xf32, #tpu.memory_space<vmem>>) attributes {dimension_semantics = [#tpu.dimension_semantics<arbitrary>], iteration_bounds = array<i64: 1>, scalar_prefetch = 0 : i64, scratch_operands = 0 : i64, tpu.core_type = #tpu.core_type<tc>, window_params = [{pipeline_mode = #tpu.pipeline_mode<synchronous>, transform_indices = @transform_0, window_bounds = array<i64: 16, 32>}, {pipeline_mode = #tpu.pipeline_mode<synchronous>, transform_indices = @transform_1, window_bounds = array<i64: 32, 512>}, {pipeline_mode = #tpu.pipeline_mode<synchronous>, transform_indices = @transform_2, window_bounds = array<i64: 2, 16, 256>}]} {
    %c0 = arith.constant 0 : index
    %c0_0 = arith.constant 0 : index
    %0 = vector.load %arg1[%c0, %c0_0] : memref<16x32xf32, #tpu.memory_space<vmem>>, vector<16x32xf32>
    %c0_1 = arith.constant 0 : index
    %c0_2 = arith.constant 0 : index
    %1 = vector.load %arg2[%c0_1, %c0_2] : memref<32x512xf32, #tpu.memory_space<vmem>>, vector<32x512xf32>
    %cst = arith.constant dense<0.000000e+00> : vector<16x512xf32>
    %2 = tpu.matmul %0, %1, %cst {dimension_numbers = #tpu.dot_dimension_numbers<[1], [0], [0], [1], [0, 0, 1, 1], [], []>, precision = #tpu.contract_precision<fp32>} : vector<16x32xf32>, vector<32x512xf32>, vector<16x512xf32> -> vector<16x512xf32>
    %cst_3 = arith.constant 3.000000e+00 : f32
    %3 = vector.broadcast %cst_3 : f32 to vector<16x512xf32>
    %4 = arith.addf %2, %3 : vector<16x512xf32>
    %cst_4 = arith.constant 0.000000e+00 : f32
    %cst_5 = arith.constant 6.000000e+00 : f32
    %5 = vector.broadcast %cst_4 : f32 to vector<16x512xf32>
    %6 = arith.maximumf %5, %4 : vector<16x512xf32>
    %7 = vector.broadcast %cst_5 : f32 to vector<16x512xf32>
    %8 = arith.minimumf %7, %6 : vector<16x512xf32>
    %cst_6 = arith.constant 0.166666672 : f32
    %9 = vector.broadcast %cst_6 : f32 to vector<16x512xf32>
    %10 = arith.mulf %8, %9 : vector<16x512xf32>
    %11 = vector.extract_strided_slice %10 {offsets = [0, 0], sizes = [16, 256], strides = [1, 1]} : vector<16x512xf32> to vector<16x256xf32>
    %c0_7 = arith.constant 0 : index
    %c0_8 = arith.constant 0 : index
    %c0_9 = arith.constant 0 : index
    %12 = vector.load %arg3[%c0_7, %c0_8, %c0_9] : memref<2x16x256xf32, #tpu.memory_space<vmem>>, vector<1x16x256xf32>
    %13 = vector.shape_cast %12 : vector<1x16x256xf32> to vector<16x256xf32>
    %14 = vector.shape_cast %11 : vector<16x256xf32> to vector<1x16x256xf32>
    tpu.vector_store %arg3[%c0_7, %c0_8, %c0_9], %14 {strides = array<i32>} : memref<2x16x256xf32, #tpu.memory_space<vmem>>, vector<1x16x256xf32>,
    %15 = vector.extract_strided_slice %10 {offsets = [0, 256], sizes = [16, 256], strides = [1, 1]} : vector<16x512xf32> to vector<16x256xf32>
    %c1 = arith.constant 1 : index
    %c0_10 = arith.constant 0 : index
    %c0_11 = arith.constant 0 : index
    %16 = vector.load %arg3[%c1, %c0_10, %c0_11] : memref<2x16x256xf32, #tpu.memory_space<vmem>>, vector<1x16x256xf32>
    %17 = vector.shape_cast %16 : vector<1x16x256xf32> to vector<16x256xf32>
    %18 = vector.shape_cast %15 : vector<16x256xf32> to vector<1x16x256xf32>
    tpu.vector_store %arg3[%c1, %c0_10, %c0_11], %18 {strides = array<i32>} : memref<2x16x256xf32, #tpu.memory_space<vmem>>, vector<1x16x256xf32>,
    return
  }
  func.func @transform_0(%arg0: i32) -> (i32, i32) {
    %c0_i32 = arith.constant 0 : i32
    %c0_i32_0 = arith.constant 0 : i32
    %c0_i32_1 = arith.constant 0 : i32
    return %c0_i32, %c0_i32_0 : i32, i32
  }
  func.func @transform_1(%arg0: i32) -> (i32, i32) {
    %c0_i32 = arith.constant 0 : i32
    %c0_i32_0 = arith.constant 0 : i32
    %c0_i32_1 = arith.constant 0 : i32
    return %c0_i32, %c0_i32_0 : i32, i32
  }
  func.func @transform_2(%arg0: i32) -> (i32, i32, i32) {
    %c0_i32 = arith.constant 0 : i32
    %c0_i32_0 = arith.constant 0 : i32
    %c0_i32_1 = arith.constant 0 : i32
    %c0_i32_2 = arith.constant 0 : i32
    return %c0_i32, %c0_i32_0, %c0_i32_1 : i32, i32, i32
  }
}

</mosaic_0001>

<bundles_post_ra>
// kernel: tpu_custom_call.1
= control target key start
LH: loop header
LB: loop body
LE: loop exit
PB: predicated region body
PF: predicated region fallthrough
CT: control target
= control target key end

     0   :  { %7 = vsyncpa [#allocation3], 0  ;;  %s1359_s0 = inlined_call_operand.hbm [shape: f32[16,32], index: 0, kind: input, shape index: {}]   ;;  %s1360_s1 = inlined_call_operand.hbm [shape: f32[32,512], index: 1, kind: input, shape index: {}]   ;;  %s1361_s2 = inlined_call_operand.hbm [shape: f32[2,16,256], index: 2, kind: output, shape index: {}]  }
   0x1   :  { %8 = vsyncpa [#allocation6], 0 }
   0x2   :  { %9 = vsyncpa [#allocation4], 0  ;;  %s14_s11 = sshll.u32 %s1359_s0, 4  ;;  %s1073_s12 = smov [#allocation2]   ;;  %s15_s11 = int_to_ptr.hbm [resolvable:$true] %s14_s11 }
   0x3   :  { %s16_s13 = sshll.u32 %s1073_s12, 4  ;;  %s27_s16 = sshll.u32 %s1360_s1, 4  ;;  %s17_s13 = int_to_ptr.vmem [resolvable:$true] %s16_s13  ;;  %s28_s16 = int_to_ptr.hbm [resolvable:$true] %s27_s16 }
   0x4   :  { %s1074_s17 = smov 128   ;;  %s1075_s18 = smov 8  }
   0x5   :  { %22 = dma.hbm_to_vmem [thread:$0]  %s15_s11, 256, %s17_s13, [#allocation3], %s1074_s17, %s1074_s17, %s1075_s18  }
   0x6   :  { %s1076_s19 = smov [#allocation5]   ;;  %s1077_s21 = smov 512  }
   0x7   :  { %s29_s20 = sshll.u32 %s1076_s19, 4  ;;  %s1078_s22 = smov 32   ;;  %s30_s20 = int_to_ptr.vmem [resolvable:$true] %s29_s20 }
   0x8   :  { %35 = dma.hbm_to_vmem [thread:$0]  %s28_s16, 2048, %s30_s20, [#allocation6], %s1077_s21, %s1077_s21, %s1078_s22  }
   0x9   :  { %1067 = dma.done.wait [#allocation3], 256  }
   0xa   :  { %1068 = vsyncadd [#allocation3], 4294967040 }
   0xb   :  { %1069 = dma.done.wait [#allocation6], 2048  }
   0xc   :  { %1070 = vsyncadd [#allocation6], 4294965248  ;;  %vm62_vm0 = vcmask 261120   ;;  %v58_v0 = vld [vmem:[#allocation5 + $0x60] sm:$0xff]  ;;  %v44_v7 = vld [vmem:[#allocation2] sm:$0xff]  ;;  %s1079_s0 = smov [#allocation7]  }
   0xd   :  { %v54_v1 = vld [vmem:[#allocation5 + $0x40] sm:$0xff]  ;;  %v1103_v3 = vand.u32 4294901760, %v58_v0  ;;  %v59_v8 = vld [vmem:[#allocation5 + $0x68] sm:$0xff]  ;;  %v64_v10 = vsel %vm62_vm0, %v44_v7, 0  ;;  %v45_v13 = vld [vmem:[#allocation2 + $0x8] sm:$0xff]  ;;  %s970_s1 = sshll.u32 %s1079_s0, 4  ;;  %s971_s1 = int_to_ptr.vmem [resolvable:$true] %s970_s1 }
   0xe   :  { %v50_v2 = vld [vmem:[#allocation5 + $0x20] sm:$0xff]  ;;  %v1105_v4 = vand.u32 4294901760, %v54_v1  ;;  %v1112_v11 = vand.u32 4294901760, %v59_v8  ;;  %v55_v12 = vld [vmem:[#allocation5 + $0x48] sm:$0xff]  ;;  %v1121_v17 = vand.u32 4294901760, %v64_v10  ;;  %v67_v21 = vsel %vm62_vm0, %v45_v13, 0 }
   0xf   :  { %v1107_v5 = vand.u32 4294901760, %v50_v2  ;;  %v46_v6 = vld [vmem:[#allocation5] sm:$0xff]  ;;  %82 = vmatpush.msra.mxu0 %v1103_v3  ;;  %v119_v14 = vsub.f32 %v58_v0, %v1103_v3  ;;  %199 = vmatpush.msra.mxu3 %v1103_v3  ;;  %v1129_v20 = vand.u32 4294901760, %v55_v12  ;;  %v1140_v28 = vand.u32 4294901760, %v67_v21  ;;  %v51_v37 = vld [vmem:[#allocation5 + $0x28] sm:$0xff]  ;;  %v60_v57 = vld [vmem:[#allocation5 + $0x70] sm:$0xff] }
  0x10   :  { %v1109_v9 = vand.u32 4294901760, %v46_v6  ;;  %v125_v15 = vsub.f32 %v54_v1, %v1105_v4  ;;  %v1127_v19 = vsub.f32 %v59_v8, %v1112_v11  ;;  %v1134_v23 = vsub.f32 %v64_v10, %v1121_v17  ;;  %v47_v38 = vld [vmem:[#allocation5 + $0x8] sm:$0xff]  ;;  %v56_v62 = vld [vmem:[#allocation5 + $0x50] sm:$0xff]  ;;  %s972_s25 = sshll.u32 %s1361_s2, 4  ;;  %s1080_s26 = smov 256   ;;  %s973_s25 = int_to_ptr.hbm [resolvable:$true] %s972_s25 }
  0x11   :  { %v1119_v16 = vsub.f32 %v50_v2, %v1107_v5  ;;  %84 = vmatpush.msra.mxu0 %v1105_v4  ;;  %165 = vmatpush.msra.mxu2 %v119_v14  ;;  %v120_v22 = vand.u32 4294901760, %v119_v14  ;;  %v1143_v29 = vsub.f32 %v55_v12, %v1129_v20  ;;  %v1155_v35 = vsub.f32 %v67_v21, %v1140_v28  ;;  %v52_v2 = vld [vmem:[#allocation5 + $0x30] sm:$0xff]  ;;  %v61_v12 = vld [vmem:[#allocation5 + $0x78] sm:$0xff]  ;;  %s1081_s27 = smov 16  }
  0x12   :  { %v1124_v18 = vsub.f32 %v46_v6, %v1109_v9  ;;  %v126_v24 = vand.u32 4294901760, %v125_v15  ;;  %201 = vmatpush.msra.mxu3 %v1105_v4  ;;  %v336_v26 = vand.u32 4294901760, %v1127_v19  ;;  %v1147_v31 = vand.u32 4294901760, %v1134_v23  ;;  %v48_v7 = vld [vmem:[#allocation5 + $0x10] sm:$0xff] }
  0x13   :  { %v132_v25 = vand.u32 4294901760, %v1119_v16  ;;  %86 = vmatpush.msra.mxu0 %v1107_v5  ;;  %168 = vmatpush.msra.mxu2 %v125_v15  ;;  %v121_v30 = vsub.f32 %v119_v14, %v120_v22  ;;  %v342_v36 = vand.u32 4294901760, %v1143_v29  ;;  %v1165_v44 = vand.u32 4294901760, %v1155_v35 }
  0x14   :  { %v138_v27 = vand.u32 4294901760, %v1124_v18  ;;  %v127_v32 = vsub.f32 %v125_v15, %v126_v24  ;;  %203 = vmatpush.msra.mxu3 %v1107_v5  ;;  %v337_v34 = vsub.f32 %v1127_v19, %v336_v26  ;;  %v92_v40 = vsub.f32 %v1134_v23, %v1147_v31 }
  0x15   :  { %v133_v33 = vsub.f32 %v1119_v16, %v132_v25  ;;  %88 = vmatpush.msra.mxu0 %v1109_v9  ;;  %v122_v39 = vand.u32 4294901760, %v121_v30  ;;  %171 = vmatpush.msra.mxu2 %v1119_v16  ;;  %v343_v45 = vsub.f32 %v1143_v29, %v342_v36  ;;  %v1173_v48 = vand.u32 4294901760, %v51_v37 }
  0x16   :  { %v128_v41 = vand.u32 4294901760, %v127_v32  ;;  %v139_v42 = vsub.f32 %v1124_v18, %v138_v27  ;;  %205 = vmatpush.msra.mxu3 %v1109_v9  ;;  %v338_v43 = vand.u32 4294901760, %v337_v34  ;;  %v1170_v46 = vand.u32 4294901760, %v92_v40  ;;  %v49_v32 = vld [vmem:[#allocation5 + $0x18] sm:$0xff] }
  0x17   :  { %234 = vmatpush.msrb.mxu0 %v120_v22  ;;  %123 = vmatpush.msra.mxu1 %v122_v39  ;;  %v134_v47 = vand.u32 4294901760, %v133_v33  ;;  %v1175_v49 = vand.u32 4294901760, %v47_v38  ;;  %v344_v50 = vand.u32 4294901760, %v343_v45  ;;  %v100_v52 = vsub.f32 %v1155_v35, %v1165_v44 }
  0x18   :  { %174 = vmatpush.msra.mxu2 %v1124_v18  ;;  %209 = vmatmul.f32.vlgmr.msra.gmra.mxu3 %v1147_v31  ;;  %v140_v51 = vand.u32 4294901760, %v139_v42  ;;  %v347_v53 = vsub.f32 %v51_v37, %v1173_v48  ;;  %v1194_v61 = vand.u32 4294901760, %v60_v57  ;;  %v1199_v1 = vand.u32 4294901760, %v56_v62 }
  0x19   :  { %177 = vmatmul.f32.vlgmr.msra.gmra.mxu2 %v1134_v23  ;;  %94 = vmatmul.f32.vlgmr.msra.gmra.mxu0 %v1170_v46  ;;  %v1184_v54 = vsub.f32 %v47_v38, %v1175_v49  ;;  %v1189_v58 = vand.u32 4294901760, %v100_v52  ;;  %v1222_v8 = vand.u32 4294901760, %v48_v7  ;;  %v1241_v14 = vand.u32 4294901760, %v61_v12 }
  0x1a   :  { %129 = vmatpush.msra.mxu1 %v128_v41  ;;  %298 = vmatpush.msrb.mxu2 %v1112_v11  ;;  %v348_v55 = vand.u32 4294901760, %v347_v53  ;;  %v1205_v6 = vsub.f32 %v60_v57, %v1194_v61  ;;  %v1280_v37 = vand.u32 4294901760, %v49_v32 }
  0x1b   :  { %339 = vmatpush.msrb.mxu3 %v338_v43  ;;  %238 = vmatpush.msrb.mxu0 %v126_v24  ;;  %v354_v56 = vand.u32 4294901760, %v1184_v54  ;;  %v1239_v13 = vsub.f32 %v48_v7, %v1222_v8  ;;  %v1250_v18 = vsub.f32 %v61_v12, %v1241_v14 }
  0x1c   :  { %135 = vmatpush.msra.mxu1 %v134_v47  ;;  %300 = vmatpush.msrb.mxu2 %v1129_v20  ;;  %v349_v59 = vsub.f32 %v347_v53, %v348_v55  ;;  %v785_v40 = vsub.f32 %v49_v32, %v1280_v37 }
  0x1d   :  { %345 = vmatpush.msrb.mxu3 %v344_v50  ;;  %242 = vmatpush.msrb.mxu0 %v132_v25  ;;  %v355_v60 = vsub.f32 %v1184_v54, %v354_v56  ;;  %v570_v21 = vand.u32 4294901760, %v1239_v13  ;;  %v768_v25 = vand.u32 4294901760, %v1250_v18 }
  0x1e   :  { %141 = vmatpush.msra.mxu1 %v140_v51  ;;  %302 = vmatpush.msrb.mxu2 %v1173_v48  ;;  %v350_v63 = vand.u32 4294901760, %v349_v59  ;;  %v786_v47 = vand.u32 4294901760, %v785_v40 }
  0x1f   :  { %143 = vmatmul.f32.vlgmr.msra.gmra.mxu1 %v1121_v17  ;;  %246 = vmatpush.msrb.mxu0 %v138_v27  ;;  %v356_v0 = vand.u32 4294901760, %v355_v60  ;;  %v571_v33 = vsub.f32 %v1239_v13, %v570_v21  ;;  %v769_v39 = vsub.f32 %v1250_v18, %v768_v25 }
  0x20   :  { %269 = vmatpush.msrb.mxu1 %v1103_v3  ;;  %215 = vmatmul.f32.gmra.mxu3 %v1165_v44  ;;  %v1210_v3 = vand.u32 4294901760, %v52_v2  ;;  %v787_v50 = vsub.f32 %v785_v40, %v786_v47 }
  0x21   :  { %182 = vmatmul.f32.gmra.mxu2 %v1155_v35  ;;  %102 = vmatmul.f32.gmra.mxu0 %v1189_v58  ;;  %v572_v42 = vand.u32 4294901760, %v571_v33  ;;  %v770_v45 = vand.u32 4294901760, %v769_v39 }
  0x22   :  { %271 = vmatpush.msrb.mxu1 %v1105_v4  ;;  %351 = vmatpush.msrb.mxu3 %v350_v63  ;;  %v1214_v4 = vsub.f32 %v56_v62, %v1199_v1  ;;  %v1227_v10 = vsub.f32 %v52_v2, %v1210_v3  ;;  %v788_v52 = vand.u32 4294901760, %v787_v50 }
  0x23   :  { %304 = vmatpush.msrb.mxu2 %v1175_v49  ;;  %381 = vmatpush.msra.mxu0 %v1127_v19  ;;  %v57_v19 = vld [vmem:[#allocation5 + $0x58] sm:$0xff] }
  0x24   :  { %273 = vmatpush.msrb.mxu1 %v1107_v5  ;;  %357 = vmatpush.msrb.mxu3 %v356_v0  ;;  %v552_v5 = vand.u32 4294901760, %v1205_v6  ;;  %v564_v15 = vand.u32 4294901760, %v1227_v10  ;;  %v1257_v22 = vand.u32 4294901760, %v57_v19 }
  0x25   :  { %450 = vmatpush.msra.mxu2 %v336_v26  ;;  %384 = vmatpush.msra.mxu0 %v1143_v29  ;;  %v53_v26 = vld [vmem:[#allocation5 + $0x38] sm:$0xff] }
  0x26   :  { %275 = vmatpush.msrb.mxu1 %v1109_v9  ;;  %485 = vmatpush.msra.mxu3 %v1112_v11  ;;  %v558_v9 = vand.u32 4294901760, %v1214_v4  ;;  %v565_v24 = vsub.f32 %v1227_v10, %v564_v15  ;;  %v1268_v29 = vsub.f32 %v57_v19, %v1257_v22  ;;  %v1270_v30 = vand.u32 4294901760, %v53_v26 }
  0x27   :  { %147 = vmatmul.f32.gmra.mxu1 %v1140_v28  ;;  %454 = vmatpush.msra.mxu2 %v342_v36 }
  0x28   :  { %415 = vmatpush.msra.mxu1 %v1112_v11  ;;  %359 = vmatmul.f32.vlgmr.msrb.gmra.mxu3 %v1121_v17  ;;  %v553_v11 = vsub.f32 %v1205_v6, %v552_v5  ;;  %v559_v16 = vsub.f32 %v1214_v4, %v558_v9  ;;  %v774_v34 = vand.u32 4294901760, %v1268_v29  ;;  %v779_v36 = vsub.f32 %v53_v26, %v1270_v30 }
  0x29   :  { %310 = vmatmul.f32.vlgmr.msrb.gmra.mxu2 %v1170_v46  ;;  %248 = vmatmul.f32.vlgmr.msrb.gmra.mxu0 %v1121_v17  ;;  %v566_v38 = vand.u32 4294901760, %v565_v24 }
  0x2a   :  { %487 = vmatpush.msra.mxu3 %v1129_v20  ;;  %417 = vmatpush.msra.mxu1 %v1129_v20  ;;  %v554_v20 = vand.u32 4294901760, %v553_v11  ;;  %v560_v27 = vand.u32 4294901760, %v559_v16  ;;  %v775_v41 = vsub.f32 %v1268_v29, %v774_v34  ;;  %v780_v43 = vand.u32 4294901760, %v779_v36 }
  0x2b   :  { %458 = vmatpush.msra.mxu2 %v348_v55  ;;  %387 = vmatpush.msra.mxu0 %v347_v53 }
  0x2c   :  { %489 = vmatpush.msra.mxu3 %v1173_v48  ;;  %419 = vmatpush.msra.mxu1 %v1173_v48  ;;  %v776_v48 = vand.u32 4294901760, %v775_v41 }
  0x2d   :  { %462 = vmatpush.msra.mxu2 %v354_v56  ;;  %390 = vmatpush.msra.mxu0 %v1184_v54 }
  0x2e   :  { %491 = vmatpush.msra.mxu3 %v1175_v49  ;;  %421 = vmatpush.msra.mxu1 %v1175_v49  ;;  %v781_v49 = vsub.f32 %v779_v36, %v780_v43 }
  0x2f   :  { %277 = vmatmul.f32.vlgmr.msrb.gmra.mxu1 %v1121_v17  ;;  %597 = vmatpush.msrb.mxu2 %v1205_v6 }
  0x30   :  { %514 = vmatpush.msrb.mxu0 %v1194_v61  ;;  %363 = vmatmul.f32.gmra.mxu3 %v1140_v28  ;;  %v782_v51 = vand.u32 4294901760, %v781_v49 }
  0x31   :  { %318 = vmatmul.f32.gmra.mxu2 %v1189_v58  ;;  %252 = vmatmul.f32.gmra.mxu0 %v1140_v28 }
  0x32   :  { %631 = vmatpush.msrb.mxu3 %v1194_v61  ;;  %555 = vmatpush.msrb.mxu1 %v554_v20 }
  0x33   :  { %600 = vmatpush.msrb.mxu2 %v1214_v4  ;;  %516 = vmatpush.msrb.mxu0 %v1199_v1 }
  0x34   :  { %633 = vmatpush.msrb.mxu3 %v1199_v1  ;;  %561 = vmatpush.msrb.mxu1 %v560_v27 }
  0x35   :  { %603 = vmatpush.msrb.mxu2 %v1227_v10  ;;  %518 = vmatpush.msrb.mxu0 %v1210_v3 }
  0x36   :  { %635 = vmatpush.msrb.mxu3 %v1210_v3  ;;  %567 = vmatpush.msrb.mxu1 %v566_v38 }
  0x37   :  { %281 = vmatmul.f32.gmra.mxu1 %v1140_v28  ;;  %606 = vmatpush.msrb.mxu2 %v1239_v13 }
  0x38   :  { %520 = vmatpush.msrb.mxu0 %v1222_v8  ;;  %493 = vmatmul.f32.vlgmr.msra.gmra.mxu3 %v1121_v17 }
  0x39   :  { %464 = vmatmul.f32.vlgmr.msra.gmra.mxu2 %v1121_v17  ;;  %393 = vmatmul.f32.vlgmr.msra.gmra.mxu0 %v1134_v23 }
  0x3a   :  { %637 = vmatpush.msrb.mxu3 %v1222_v8  ;;  %573 = vmatpush.msrb.mxu1 %v572_v42 }
  0x3b   :  { %730 = vmatpush.msra.mxu2 %v1241_v14  ;;  %666 = vmatpush.msra.mxu0 %v552_v5 }
  0x3c   :  { %771 = vmatpush.msra.mxu3 %v770_v45 }
  0x3d   :  { %732 = vmatpush.msra.mxu2 %v1257_v22  ;;  %670 = vmatpush.msra.mxu0 %v558_v9 }
  0x3e   :  { %777 = vmatpush.msra.mxu3 %v776_v48 }
  0x3f   :  { %425 = vmatmul.f32.vlgmr.msra.gmra.mxu1 %v1147_v31  ;;  %734 = vmatpush.msra.mxu2 %v1270_v30 }
  0x40   :  { %701 = vmatpush.msra.mxu1 %v1194_v61  ;;  %674 = vmatpush.msra.mxu0 %v564_v15 }
  0x41   :  { %468 = vmatmul.f32.gmra.mxu2 %v1140_v28  ;;  %497 = vmatmul.f32.gmra.mxu3 %v1140_v28 }
  0x42   :  { %398 = vmatmul.f32.gmra.mxu0 %v1155_v35  ;;  %703 = vmatpush.msra.mxu1 %v1199_v1 }
  0x43   :  { %783 = vmatpush.msra.mxu3 %v782_v51  ;;  %736 = vmatpush.msra.mxu2 %v1280_v37 }
  0x44   :  { %705 = vmatpush.msra.mxu1 %v1210_v3  ;;  %678 = vmatpush.msra.mxu0 %v570_v21 }
  0x45   :  { %789 = vmatpush.msra.mxu3 %v788_v52 }
  0x46   :  { %707 = vmatpush.msra.mxu1 %v1222_v8 }
  0x47   :  { %431 = vmatmul.f32.gmra.mxu1 %v1165_v44 }
  0x49   :  { %609 = vmatmul.f32.vlgmr.msrb.gmra.mxu2 %v1134_v23  ;;  %641 = vmatmul.f32.vlgmr.msrb.gmra.mxu3 %v1147_v31 }
  0x4a   :  { %526 = vmatmul.f32.vlgmr.msrb.gmra.mxu0 %v1170_v46  ;;  %882 = vmatpush.msrb.mxu2 %v768_v25 }
  0x4b   :  { %813 = vmatpush.msrb.mxu0 %v1250_v18  ;;  %917 = vmatpush.msrb.mxu3 %v1241_v14 }
  0x4c   :  { %886 = vmatpush.msrb.mxu2 %v774_v34 }
  0x4d   :  { %816 = vmatpush.msrb.mxu0 %v1268_v29  ;;  %919 = vmatpush.msrb.mxu3 %v1257_v22 }
  0x4e   :  { %890 = vmatpush.msrb.mxu2 %v780_v43 }
  0x4f   :  { %575 = vmatmul.f32.vlgmr.msrb.gmra.mxu1 %v1121_v17  ;;  %819 = vmatpush.msrb.mxu0 %v779_v36 }
  0x50   :  { %847 = vmatpush.msrb.mxu1 %v1241_v14  ;;  %921 = vmatpush.msrb.mxu3 %v1270_v30 }
  0x51   :  { %614 = vmatmul.f32.gmra.mxu2 %v1155_v35  ;;  %647 = vmatmul.f32.gmra.mxu3 %v1165_v44 }
  0x52   :  { %534 = vmatmul.f32.gmra.mxu0 %v1189_v58  ;;  %849 = vmatpush.msrb.mxu1 %v1257_v22 }
  0x53   :  { %894 = vmatpush.msrb.mxu2 %v786_v47  ;;  %822 = vmatpush.msrb.mxu0 %v785_v40 }
  0x54   :  { %851 = vmatpush.msrb.mxu1 %v1270_v30  ;;  %923 = vmatpush.msrb.mxu3 %v1280_v37 }
  0x56   :  { %853 = vmatpush.msrb.mxu1 %v1280_v37 }
  0x57   :  { %579 = vmatmul.f32.gmra.mxu1 %v1140_v28 }
  0x59   :  { %742 = vmatmul.f32.vlgmr.msra.gmra.mxu2 %v1170_v46  ;;  %791 = vmatmul.f32.vlgmr.msra.gmra.mxu3 %v1121_v17 }
  0x5a   :  { %680 = vmatmul.f32.vlgmr.msra.gmra.mxu0 %v1121_v17 }
  0x5f   :  { %709 = vmatmul.f32.vlgmr.msra.gmra.mxu1 %v1121_v17 }
  0x61   :  { %750 = vmatmul.f32.gmra.mxu2 %v1189_v58  ;;  %795 = vmatmul.f32.gmra.mxu3 %v1140_v28 }
  0x62   :  { %684 = vmatmul.f32.gmra.mxu0 %v1140_v28 }
  0x67   :  { %713 = vmatmul.f32.gmra.mxu1 %v1140_v28 }
  0x69   :  { %896 = vmatmul.f32.vlgmr.msrb.gmra.mxu2 %v1121_v17  ;;  %925 = vmatmul.f32.vlgmr.msrb.gmra.mxu3 %v1121_v17 }
  0x6a   :  { %825 = vmatmul.f32.vlgmr.msrb.gmra.mxu0 %v1134_v23 }
  0x6f   :  { %857 = vmatmul.f32.vlgmr.msrb.gmra.mxu1 %v1147_v31 }
  0x71   :  { %900 = vmatmul.f32.gmra.mxu2 %v1140_v28  ;;  %929 = vmatmul.f32.gmra.mxu3 %v1140_v28 }
  0x72   :  { %830 = vmatmul.f32.gmra.mxu0 %v1155_v35 }
  0x77   :  { %863 = vmatmul.f32.gmra.mxu1 %v1165_v44 }
  0x96   :  { %v95_v46 = vpop.f32.mrf.mxu0 }
  0x97   :  { %v96_v55 = vadd.f32 3.0, %v95_v46 }
  0x9b   :  { %v210_v56 = vpop.f32.mrf.mxu3 }
  0x9c   :  { %v144_v53 = vpop.f32.mrf.mxu1  ;;  %v178_v54 = vpop.f32.mrf.mxu2 }
  0x9d   :  { %v145_v58 = vadd.f32 %v144_v53, %v96_v55 }
  0x9e   :  { %v103_v57 = vpop.f32.mrf.mxu0 }
  0x9f   :  { %v104_v23 = vadd.f32 3.0, %v103_v57  ;;  %v179_v60 = vadd.f32 %v178_v54, %v145_v58 }
  0xa1   :  { %v211_v62 = vadd.f32 %v210_v56, %v179_v60 }
  0xa3   :  { %v216_v31 = vpop.f32.mrf.mxu3 }
  0xa4   :  { %v148_v17 = vpop.f32.mrf.mxu1  ;;  %v183_v59 = vpop.f32.mrf.mxu2 }
  0xa5   :  { %v149_v63 = vadd.f32 %v148_v17, %v104_v23 }
  0xa6   :  { %v249_v61 = vpop.f32.mrf.mxu0 }
  0xa7   :  { %v250_v28 = vadd.f32 %v249_v61, %v211_v62  ;;  %v184_v1 = vadd.f32 %v183_v59, %v149_v63 }
  0xa9   :  { %v217_v7 = vadd.f32 %v216_v31, %v184_v1 }
  0xab   :  { %v360_v2 = vpop.f32.mrf.mxu3 }
  0xac   :  { %v278_v0 = vpop.f32.mrf.mxu1  ;;  %v311_v35 = vpop.f32.mrf.mxu2 }
  0xad   :  { %v279_v44 = vadd.f32 %v278_v0, %v250_v28  ;;  %v312_v12 = vadd.f32 3.0, %v311_v35 }
  0xae   :  { %v253_v3 = vpop.f32.mrf.mxu0 }
  0xaf   :  { %v933_v6 = vmax.f32 %v279_v44, 0.0  ;;  %v254_v8 = vadd.f32 %v253_v3, %v217_v7  ;;  %v361_v16 = vadd.f32 %v360_v2, %v312_v12 }
  0xb1   :  { %v941_v4 = vmin.f32 %v933_v6, 6.0 }
  0xb3   :  { %v949_v5 = vmul.f32 0.16666667, %v941_v4  ;;  %v364_v13 = vpop.f32.mrf.mxu3 }
  0xb4   :  { %v282_v10 = vpop.f32.mrf.mxu1  ;;  %v319_v9 = vpop.f32.mrf.mxu2 }
  0xb5   :  { %957 = vst [vmem:[#allocation7] sm:$0xff] %v949_v5  ;;  %v283_v11 = vadd.f32 %v282_v10, %v254_v8  ;;  %v320_v24 = vadd.f32 3.0, %v319_v9 }
  0xb6   :  { %v394_v15 = vpop.f32.mrf.mxu0 }
  0xb7   :  { %v937_v14 = vmax.f32 %v283_v11, 0.0  ;;  %v395_v20 = vadd.f32 %v394_v15, %v361_v16  ;;  %v365_v30 = vadd.f32 %v364_v13, %v320_v24 }
  0xb9   :  { %v945_v18 = vmin.f32 %v937_v14, 6.0 }
  0xbb   :  { %v953_v19 = vmul.f32 0.16666667, %v945_v18  ;;  %v494_v26 = vpop.f32.mrf.mxu3 }
  0xbc   :  { %v426_v21 = vpop.f32.mrf.mxu1  ;;  %v465_v22 = vpop.f32.mrf.mxu2 }
  0xbd   :  { %959 = vst [vmem:[#allocation7 + $0x10] sm:$0xff] %v953_v19  ;;  %v427_v25 = vadd.f32 %v426_v21, %v395_v20 }
  0xbf   :  { %v399_v27 = vpop.f32.mrf.mxu0  ;;  %v466_v29 = vadd.f32 %v465_v22, %v427_v25 }
  0xc0   :  { %v400_v33 = vadd.f32 %v399_v27, %v365_v30 }
  0xc1   :  { %v495_v32 = vadd.f32 %v494_v26, %v466_v29 }
  0xc3   :  { %v934_v34 = vmax.f32 %v495_v32, 0.0 }
  0xc4   :  { %v432_v36 = vpop.f32.mrf.mxu1  ;;  %v469_v37 = vpop.f32.mrf.mxu2 }
  0xc5   :  { %v942_v38 = vmin.f32 %v934_v34, 6.0  ;;  %v433_v39 = vadd.f32 %v432_v36, %v400_v33  ;;  %v498_v40 = vpop.f32.mrf.mxu3 }
  0xc7   :  { %v950_v41 = vmul.f32 0.16666667, %v942_v38  ;;  %v470_v42 = vadd.f32 %v469_v37, %v433_v39  ;;  %v527_v43 = vpop.f32.mrf.mxu0 }
  0xc8   :  { %v528_v50 = vadd.f32 3.0, %v527_v43 }
  0xc9   :  { %958 = vst [vmem:[#allocation7 + $0x8] sm:$0xff] %v950_v41  ;;  %v499_v45 = vadd.f32 %v498_v40, %v470_v42 }
  0xcb   :  { %v938_v47 = vmax.f32 %v499_v45, 0.0 }
  0xcc   :  { %v576_v48 = vpop.f32.mrf.mxu1  ;;  %v610_v49 = vpop.f32.mrf.mxu2 }
  0xcd   :  { %v946_v51 = vmin.f32 %v938_v47, 6.0  ;;  %v642_v52 = vpop.f32.mrf.mxu3  ;;  %v577_v54 = vadd.f32 %v576_v48, %v528_v50 }
  0xcf   :  { %v954_v46 = vmul.f32 0.16666667, %v946_v51  ;;  %v535_v53 = vpop.f32.mrf.mxu0  ;;  %v611_v58 = vadd.f32 %v610_v49, %v577_v54 }
  0xd0   :  { %v536_v57 = vadd.f32 3.0, %v535_v53 }
  0xd1   :  { %960 = vst [vmem:[#allocation7 + $0x18] sm:$0xff] %v954_v46  ;;  %v643_v23 = vadd.f32 %v642_v52, %v611_v58 }
  0xd4   :  { %v580_v55 = vpop.f32.mrf.mxu1  ;;  %v615_v56 = vpop.f32.mrf.mxu2 }
  0xd5   :  { %v648_v17 = vpop.f32.mrf.mxu3  ;;  %v581_v60 = vadd.f32 %v580_v55, %v536_v57 }
  0xd7   :  { %v681_v59 = vpop.f32.mrf.mxu0  ;;  %v616_v63 = vadd.f32 %v615_v56, %v581_v60 }
  0xd8   :  { %v682_v31 = vadd.f32 %v681_v59, %v643_v23 }
  0xd9   :  { %v649_v44 = vadd.f32 %v648_v17, %v616_v63 }
  0xdc   :  { %v710_v61 = vpop.f32.mrf.mxu1  ;;  %v743_v62 = vpop.f32.mrf.mxu2 }
  0xdd   :  { %v711_v28 = vadd.f32 %v710_v61, %v682_v31  ;;  %v792_v0 = vpop.f32.mrf.mxu3  ;;  %v744_v5 = vadd.f32 3.0, %v743_v62 }
  0xdf   :  { %v935_v35 = vmax.f32 %v711_v28, 0.0  ;;  %v685_v1 = vpop.f32.mrf.mxu0  ;;  %v793_v11 = vadd.f32 %v792_v0, %v744_v5 }
  0xe0   :  { %v686_v3 = vadd.f32 %v685_v1, %v649_v44 }
  0xe1   :  { %v943_v2 = vmin.f32 %v935_v35, 6.0 }
  0xe3   :  { %v951_v6 = vmul.f32 0.16666667, %v943_v2 }
  0xe4   :  { %v714_v7 = vpop.f32.mrf.mxu1  ;;  %v751_v4 = vpop.f32.mrf.mxu2 }
  0xe5   :  { %962 = vst [vmem:[#allocation7 + $0x20] sm:$0xff] %v951_v6  ;;  %v715_v8 = vadd.f32 %v714_v7, %v686_v3  ;;  %v796_v10 = vpop.f32.mrf.mxu3  ;;  %v752_v19 = vadd.f32 3.0, %v751_v4 }
  0xe7   :  { %v939_v9 = vmax.f32 %v715_v8, 0.0  ;;  %v826_v12 = vpop.f32.mrf.mxu0  ;;  %v797_v25 = vadd.f32 %v796_v10, %v752_v19 }
  0xe8   :  { %v827_v15 = vadd.f32 %v826_v12, %v793_v11 }
  0xe9   :  { %v947_v13 = vmin.f32 %v939_v9, 6.0 }
  0xeb   :  { %v955_v14 = vmul.f32 0.16666667, %v947_v13 }
  0xec   :  { %v858_v16 = vpop.f32.mrf.mxu1  ;;  %v897_v18 = vpop.f32.mrf.mxu2 }
  0xed   :  { %964 = vst [vmem:[#allocation7 + $0x30] sm:$0xff] %v955_v14  ;;  %v859_v20 = vadd.f32 %v858_v16, %v827_v15  ;;  %v926_v21 = vpop.f32.mrf.mxu3 }
  0xef   :  { %v898_v22 = vadd.f32 %v897_v18, %v859_v20  ;;  %v831_v24 = vpop.f32.mrf.mxu0 }
  0xf0   :  { %v832_v27 = vadd.f32 %v831_v24, %v797_v25 }
  0xf1   :  { %v927_v26 = vadd.f32 %v926_v21, %v898_v22 }
  0xf3   :  { %v936_v29 = vmax.f32 %v927_v26, 0.0 }
  0xf4   :  { %v864_v30 = vpop.f32.mrf.mxu1  ;;  %v901_v32 = vpop.f32.mrf.mxu2 }
  0xf5   :  { %v944_v33 = vmin.f32 %v936_v29, 6.0  ;;  %v865_v34 = vadd.f32 %v864_v30, %v832_v27  ;;  %v930_v36 = vpop.f32.mrf.mxu3 }
  0xf7   :  { %v952_v37 = vmul.f32 0.16666667, %v944_v33  ;;  %v902_v38 = vadd.f32 %v901_v32, %v865_v34 }
  0xf9   :  { %963 = vst [vmem:[#allocation7 + $0x28] sm:$0xff] %v952_v37  ;;  %v931_v39 = vadd.f32 %v930_v36, %v902_v38 }
  0xfb   :  { %v940_v40 = vmax.f32 %v931_v39, 0.0 }
  0xfd   :  { %v948_v41 = vmin.f32 %v940_v40, 6.0 }
  0xff   :  { %v956_v42 = vmul.f32 0.16666667, %v948_v41 }
 0x101   :  { %965 = vst [vmem:[#allocation7 + $0x38] sm:$0xff] %v956_v42 }
 0x102   :  { %978 = dma.vmem_to_hbm [thread:$0]  %s971_s1, 1024, %s973_s25, [#allocation4], %s1080_s26, %s1080_s26, %s1081_s27  }
 0x103   :  { %1071 = dma.done.wait [#allocation4], 1024  }
 0x104   :  { %1072 = vsyncadd [#allocation4], 4294966272 }
 0x105   :  { %983 = vsyncpa [#allocation3], 1 }
 0x106   :  { %984 = vsyncpa [#allocation6], 1 }
 0x107   :  { %985 = vsyncpa [#allocation4], 1 }

</bundles_post_ra>
